<compile_context>
chip_gen: v7x
topology: tpu7x:2x2x1
jax: 0.10.0
libtpu: 0.0.40
codegen_flags: <defaults>
</compile_context>

<pallas_src>
import numpy as np
import jax
import jax.numpy as jnp
from jax.experimental import pallas as pl
from jax.experimental.pallas import tpu as pltpu


def _ts_mean_kernel(x_ref, wt_ref, o_ref):
    # x_ref:  (Bb, T, F)   block of batch elements
    # wt_ref: (T, S)       window-averaging matrix, transposed (constant block)
    # o_ref:  (Bb, F, S)   rolling means, already in the PyTorch output layout
    wt = wt_ref[...]
    for b in range(x_ref.shape[0]):            # small static unroll over the sub-batch
        xb = x_ref[b].astype(jnp.float32)      # (T, F); no-op for f32 inputs
        # Contract over T on the MXU (lhs-transposed dot): (F, S) = xb^T @ wt
        res = jax.lax.dot_general(
            xb, wt,
            dimension_numbers=(((0,), (0,)), ((), ())),
            preferred_element_type=jnp.float32)
        o_ref[b] = res.astype(o_ref.dtype)


def ts_mean_pallas(x, window=5, strides=1, block_b=8):
    """Pallas implementation of the ts_mean module's forward pass.

    x: (B, T, F)  ->  (B, F, S)
    """
    B, T, F = x.shape
    starts = list(range(0, T - window + 1, strides))
    if (T - window) not in starts:
        starts.append(T - window)
    S = len(starts)

    # Constant window-averaging matrix, built transposed (T, S) so the kernel
    # emits the (F, S) layout directly (no wrapper transpose afterwards).
    WmatT = np.zeros((T, S), np.float32)
    for s, st in enumerate(starts):
        WmatT[st:st + window, s] = 1.0 / float(window)

    # Block several batch elements per grid step to amortize per-step overhead.
    Bb = min(block_b, B)
    Bp = ((B + Bb - 1) // Bb) * Bb
    x_in = x if Bp == B else jnp.pad(x, ((0, Bp - B), (0, 0), (0, 0)))

    out = pl.pallas_call(
        _ts_mean_kernel,
        out_shape=jax.ShapeDtypeStruct((Bp, F, S), x.dtype),
        grid_spec=pltpu.PrefetchScalarGridSpec(
            num_scalar_prefetch=0,
            grid=(Bp // Bb,),
            in_specs=[
                pl.BlockSpec((Bb, T, F), lambda i: (i, 0, 0)),
                pl.BlockSpec((T, S), lambda i: (0, 0)),   # constant across the grid
            ],
            out_specs=pl.BlockSpec((Bb, F, S), lambda i: (i, 0, 0)),
        ),
        compiler_params=pltpu.CompilerParams(
            dimension_semantics=("parallel",)),
    )(x_in, jnp.asarray(WmatT))

    return out if Bp == B else out[:B]


def ts_mean_reference(x, window=5, strides=1):
    """Pure-JAX replica of the PyTorch forward for verification."""
    B, T, F = x.shape
    starts = list(range(0, T - window + 1, strides))
    if (T - window) not in starts:
        starts.append(T - window)
    means = [jnp.mean(x[:, st:st + window], axis=1) for st in starts]  # each (B, F)
    out = jnp.stack(means, axis=1)            # (B, S, F)
    return jnp.transpose(out, (0, 2, 1))      # (B, F, S)


if __name__ == "__main__":
    key = jax.random.PRNGKey(0)
    B, T, F = 2, 16, 4          # batch=2, time=16, features=4
    window, strides = 5, 1
    x = jax.random.normal(key, (B, T, F), dtype=jnp.float32)

    out = jax.block_until_ready(ts_mean_pallas(x, window=window, strides=strides))
    ref = jax.block_until_ready(ts_mean_reference(x, window=window, strides=strides))

    assert out.shape == ref.shape, (out.shape, ref.shape)
    np.testing.assert_allclose(np.asarray(out), np.asarray(ref), rtol=1e-5, atol=1e-5)

    print("KERNEL_OK")
</pallas_src>

<mosaic_0001>
module attributes {stable_mosaic.version = 11 : i64} {
  func.func @_ts_mean_kernel(%arg0: i32, %arg1: memref<2x16x4xf32, #tpu.memory_space<vmem>>, %arg2: memref<16x12xf32, #tpu.memory_space<vmem>>, %arg3: memref<2x4x12xf32, #tpu.memory_space<vmem>>) attributes {dimension_semantics = [#tpu.dimension_semantics<parallel>], iteration_bounds = array<i64: 1>, scalar_prefetch = 0 : i64, scratch_operands = 0 : i64, tpu.core_type = #tpu.core_type<tc>, window_params = [{transform_indices = @transform_0, window_bounds = array<i64: 2, 16, 4>}, {pipeline_mode = #tpu.pipeline_mode<synchronous>, transform_indices = @transform_1, window_bounds = array<i64: 16, 12>}, {transform_indices = @transform_2, window_bounds = array<i64: 2, 4, 12>}]} {
    %c0 = arith.constant 0 : index
    %c0_0 = arith.constant 0 : index
    %0 = vector.load %arg2[%c0, %c0_0] : memref<16x12xf32, #tpu.memory_space<vmem>>, vector<16x12xf32>
    %c0_1 = arith.constant 0 : index
    %c0_2 = arith.constant 0 : index
    %c0_3 = arith.constant 0 : index
    %1 = vector.load %arg1[%c0_1, %c0_2, %c0_3] : memref<2x16x4xf32, #tpu.memory_space<vmem>>, vector<1x16x4xf32>
    %2 = vector.shape_cast %1 : vector<1x16x4xf32> to vector<16x4xf32>
    %cst = arith.constant dense<0.000000e+00> : vector<4x12xf32>
    %3 = tpu.matmul %2, %0, %cst {dimension_numbers = #tpu.dot_dimension_numbers<[0], [0], [1], [1], [0, 1, 1, 1], [], []>} : vector<16x4xf32>, vector<16x12xf32>, vector<4x12xf32> -> vector<4x12xf32>
    %c0_4 = arith.constant 0 : index
    %c0_5 = arith.constant 0 : index
    %c0_6 = arith.constant 0 : index
    %4 = vector.load %arg3[%c0_4, %c0_5, %c0_6] : memref<2x4x12xf32, #tpu.memory_space<vmem>>, vector<1x4x12xf32>
    %5 = vector.shape_cast %4 : vector<1x4x12xf32> to vector<4x12xf32>
    %6 = vector.shape_cast %3 : vector<4x12xf32> to vector<1x4x12xf32>
    tpu.vector_store %arg3[%c0_4, %c0_5, %c0_6], %6 {strides = array<i32>} : memref<2x4x12xf32, #tpu.memory_space<vmem>>, vector<1x4x12xf32>,
    %c1 = arith.constant 1 : index
    %c0_7 = arith.constant 0 : index
    %c0_8 = arith.constant 0 : index
    %7 = vector.load %arg1[%c1, %c0_7, %c0_8] : memref<2x16x4xf32, #tpu.memory_space<vmem>>, vector<1x16x4xf32>
    %8 = vector.shape_cast %7 : vector<1x16x4xf32> to vector<16x4xf32>
    %cst_9 = arith.constant dense<0.000000e+00> : vector<4x12xf32>
    %9 = tpu.matmul %8, %0, %cst_9 {dimension_numbers = #tpu.dot_dimension_numbers<[0], [0], [1], [1], [0, 1, 1, 1], [], []>} : vector<16x4xf32>, vector<16x12xf32>, vector<4x12xf32> -> vector<4x12xf32>
    %c1_10 = arith.constant 1 : index
    %c0_11 = arith.constant 0 : index
    %c0_12 = arith.constant 0 : index
    %10 = vector.load %arg3[%c1_10, %c0_11, %c0_12] : memref<2x4x12xf32, #tpu.memory_space<vmem>>, vector<1x4x12xf32>
    %11 = vector.shape_cast %10 : vector<1x4x12xf32> to vector<4x12xf32>
    %12 = vector.shape_cast %9 : vector<4x12xf32> to vector<1x4x12xf32>
    tpu.vector_store %arg3[%c1_10, %c0_11, %c0_12], %12 {strides = array<i32>} : memref<2x4x12xf32, #tpu.memory_space<vmem>>, vector<1x4x12xf32>,
    return
  }
  func.func @transform_0(%arg0: i32) -> (i32, i32, i32) {
    %c0_i32 = arith.constant 0 : i32
    %c0_i32_0 = arith.constant 0 : i32
    %c0_i32_1 = arith.constant 0 : i32
    return %arg0, %c0_i32, %c0_i32_0 : i32, i32, i32
  }
  func.func @transform_1(%arg0: i32) -> (i32, i32) {
    %c0_i32 = arith.constant 0 : i32
    %c0_i32_0 = arith.constant 0 : i32
    %c0_i32_1 = arith.constant 0 : i32
    return %c0_i32, %c0_i32_0 : i32, i32
  }
  func.func @transform_2(%arg0: i32) -> (i32, i32, i32) {
    %c0_i32 = arith.constant 0 : i32
    %c0_i32_0 = arith.constant 0 : i32
    %c0_i32_1 = arith.constant 0 : i32
    return %arg0, %c0_i32, %c0_i32_0 : i32, i32, i32
  }
}

</mosaic_0001>

<bundles_post_ra>
// kernel: tpu_custom_call.1
= control target key start
LH: loop header
LB: loop body
LE: loop exit
PB: predicated region body
PF: predicated region fallthrough
CT: control target
= control target key end

     0   :  { %v310_v6 = vmov 0.0|0.0   ;;  %s361_s0 = inlined_call_operand.vmem [shape: f32[2,16,4], index: 0, kind: input, shape index: {}]   ;;  %s362_s1 = inlined_call_operand.vmem [shape: f32[16,12], index: 1, kind: input, shape index: {}]   ;;  %s363_s2 = inlined_call_operand.hbm [shape: f32[2,4,12], index: 2, kind: output, shape index: {}]  }
   0x1   :  { %v251_v0 = vld [vmem:[%s361_s0 + $0x10] sm:$0xff]  ;;  %v14_v1 = vld [vmem:[%s361_s0] sm:$0xff]  ;;  %v13_v3 = vld [vmem:[%s362_s1 + $0x8] sm:$0xff]  ;;  %274 = vmatprep.subr.bf16.mxu0 %v310_v6  ;;  %277 = vmatprep.subr.bf16.mxu1 %v310_v6 }
   0x2   :  { %127 = vxpose.xlu1.b32.start [1/2] (short) (narrow) %v251_v0, 8  ;;  %16 = vxpose.xlu0.b32.start [1/2] (short) (narrow) %v14_v1, 8  ;;  %v12_v2 = vld [vmem:[%s362_s1] sm:$0xff]  ;;  %v252_v4 = vld [vmem:[%s361_s0 + $0x18] sm:$0xff]  ;;  %v15_v5 = vld [vmem:[%s361_s0 + $0x8] sm:$0xff] }
   0x3   :  { %v275_v7 = vpack.c.bf16 %v13_v3, %v12_v2 }
   0x4   :  { %7 = vsyncpa [#allocation3], 0  ;;  %vm311_vm0 = vmmov 0   ;;  %v312_v8 = vmov 0.0   ;;  %vm48_vm1 = vcmask 130048   ;;  %s313_s1 = smov [#allocation2]  }
   0x5   :  { %264 = vmatprep.mubr.msk.f32.mxu0 %vm311_vm0, %v312_v8  ;;  %271 = vmatprep.mubr.msk.f32.mxu1 %vm311_vm0, %v312_v8  ;;  %s239_s0 = sshll.u32 %s313_s1, 4  ;;  %vm122_vm2 = vcmask 93184   ;;  %s240_s0 = int_to_ptr.vmem [resolvable:$true] %s239_s0 }
   0x6   :  { %276 = vmatpush3.bf16.msra.mxu0 %v275_v7  ;;  %279 = vmatpush3.bf16.msra.mxu1 %v275_v7  ;;  %s286_s21 = scalar_lea.vmem %s240_s0, 128  ;;  %p291_p1 = scmp.lt.s32.totalorder %s240_s0, %s240_s0 }
   0x7   :  { %128 = vxpose.xlu1.b32.end [2/2] (short) (narrow) %v252_v4, 8  ;;  %17 = vxpose.xlu0.b32.end [2/2] (short) (narrow) %v15_v5, 8  ;;  %p287_p0 = scmp.ne.s32.totalorder %s240_s0, %s286_s21  ;;  %p292_p2 = scmp.lt.s32.totalorder %s286_s21, %s286_s21 }
   0x9   :  { %p293_p3 = por %p292_p2, %p291_p1 }
   0xb   :  { %p294_p4 = pnand %p293_p3, %p287_p0 }
  0x83   :  { %v143_v9 = vpop.trf.xlu1  ;;  %v32_v10 = vpop.trf.xlu0 }
  0x84   :  { %265 = vmatmul.mubr.msk.f32.vlgmr.msra.gmra.mrb[0].mxu0 %vm48_vm1, %v32_v10  ;;  %272 = vmatmul.mubr.msk.f32.vlgmr.msra.gmra.mrb[0].mxu1 %vm48_vm1, %v143_v9 }
 0x157   :  { %v118_v11 = vpop.f32.mrb[0].mxu0  ;;  %v228_v12 = vpop.f32.mrb[0].mxu1 }
 0x158   :  { %123 = vst.msk [vmem:[#allocation2] sm:$0xf] %vm122_vm2, %v118_v11  ;;  %233 = vst.msk [vmem:[#allocation2 + $0x4] sm:$0xf] %vm122_vm2, %v228_v12  ;;  %v266_v13 = vpop.f32.mrb[1].mxu0  ;;  %v273_v14 = vpop.f32.mrb[1].mxu1 }
 0x159   :  { %297 = shalt.err (!%p294_p4)
}
 0x15a   :  { %s298_s24 = scalar_lea.hbm %s363_s2, 128 }
 0x15b   :  { %p299_p5 = scmp.ne.s32.totalorder %s363_s2, %s298_s24  ;;  %p302_p6 = scmp.lt.u32.totalorder %s298_s24, %s363_s2 }
 0x15d   :  { %p304_p7 = pnand %p302_p6, %p299_p5 }
 0x15f   :  { %307 = shalt.err (!%p304_p7)
}
 0x160   :  { %s314_s29 = smov 64   ;;  %s315_s30 = smov 4  }
 0x161   :  { %245 = dma.vmem_to_hbm [thread:$0]  %s240_s0, 128, %s363_s2, [#allocation3], %s314_s29, %s314_s29, %s315_s30  }
 0x162   :  { %308 = dma.done.wait [#allocation3], 128  }
 0x163   :  { %309 = vsyncadd [#allocation3], 4294967168 }
 0x164   :  { %249 = vsyncpa [#allocation3], 1 }

</bundles_post_ra>
